<compile_context>
chip_gen: v7x
topology: tpu7x:2x2x1
jax: 0.10.0
libtpu: 0.0.40
codegen_flags: <defaults>
</compile_context>

<pallas_src>
import jax
import jax.numpy as jnp
from jax import lax
from jax.experimental import pallas as pl
from jax.experimental.pallas import tpu as pltpu

EPS = 1e-5                      # nn.BatchNorm2d default
_VMEM_LIMIT = 32 * 1024 * 1024  # explicit, safe on v5e/v6e/v7x


# ----------------------------- kernels -------------------------------------


def _conv_stats_kernel(x_ref, w_ref, sum_ref, ssq_ref):
    """Pass 1: conv matmul + accumulate per-(w,c)-column sum and sum-of-squares.

    x_ref:   [TR, W*Cin]        bf16   (row tile of channels-last input rows)
    w_ref:   [W*Cin, Wout*Cout] bf16   (block-Toeplitz conv weight)
    sum_ref: [1, Wout*Cout]     f32    (resident accumulator across the grid)
    ssq_ref: [1, Wout*Cout]     f32
    """
    @pl.when(pl.program_id(0) == 0)
    def _init():
        sum_ref[...] = jnp.zeros_like(sum_ref)
        ssq_ref[...] = jnp.zeros_like(ssq_ref)

    acc = jnp.dot(x_ref[...], w_ref[...], preferred_element_type=jnp.float32)
    sum_ref[...] += jnp.sum(acc, axis=0, keepdims=True)
    ssq_ref[...] += jnp.sum(acc * acc, axis=0, keepdims=True)


def _conv_bn_relu_kernel(x_ref, w_ref, scsh_ref, o_ref):
    """Pass 2: conv matmul + fused BN affine + ReLU, lane-dense store.

    x_ref:    [TR, W*Cin]        bf16
    w_ref:    [W*Cin, Wout*Cout] bf16
    scsh_ref: [2, Wout*Cout]     f32   (row 0 = scale, row 1 = shift)
    o_ref:    [TR, Wout*Cout]    f32
    """
    acc = jnp.dot(x_ref[...], w_ref[...], preferred_element_type=jnp.float32)
    scsh = scsh_ref[...]
    y = acc * scsh[0:1, :] + scsh[1:2, :]
    o_ref[...] = jnp.maximum(y, 0.0).astype(o_ref.dtype)


# ----------------------------- wrapper --------------------------------------


def _default_row_tile(rows, w_cin, wout_cout):
    """Largest row tile keeping the double-buffered in/out streams within a
    conservative VMEM budget (sized for v7x's 64 MiB physical / 32 MiB
    default-scoped VMEM, i.e. half of v5e/v6e)."""
    per_row = w_cin * 2 + wout_cout * 4          # bf16 input + f32 output, bytes
    budget = 4 * 1024 * 1024                     # stream budget (x2 double-buf)
    tile = budget // (2 * per_row)
    tile = max(8, min(int(tile), 2048))
    tile = min(tile, max(8, ((rows + 7) // 8) * 8))
    return max(8, (tile // 8) * 8)


def basic_block_forward(x, conv_w, conv_b, bn_gamma, bn_beta, *, row_tile=None):
    """x: [N, Cin, H, W] f32; conv_w: [Cout, Cin, 1, KW]. Returns NCHW f32.

    conv_b is accepted for interface parity with the PyTorch module but is
    unused: training-mode BatchNorm cancels the conv bias exactly.
    """
    del conv_b
    N, Cin, H, W = x.shape
    Cout, _, KH, KW = conv_w.shape
    assert KH == 1
    Wout = W - KW + 1
    WCin = W * Cin
    WoutCout = Wout * Cout
    rows = N * H

    if row_tile is None:
        row_tile = _default_row_tile(rows, WCin, WoutCout)
    row_tile = max(8, (int(row_tile) // 8) * 8)
    n_tiles = -(-rows // row_tile)
    rows_pad = n_tiles * row_tile

    # ---- glue: channels-last rows, bf16, zero-pad rows to the tile grid ----
    x2d = jnp.transpose(x, (0, 2, 3, 1)).reshape(rows, WCin).astype(jnp.bfloat16)
    x2d = jnp.pad(x2d, ((0, rows_pad - rows), (0, 0)))

    # ---- block-Toeplitz conv weight: [W*Cin, Wout*Cout], bf16 ----
    # wk[kw*Cin + ci, co] = conv_w[co, ci, 0, kw]
    wk = jnp.transpose(conv_w[:, :, 0, :], (2, 1, 0)).reshape(KW * Cin, Cout)
    cols = [jnp.pad(wk, ((w * Cin, (W - KW - w) * Cin), (0, 0)))
            for w in range(Wout)]
    wbig = jnp.concatenate(cols, axis=1).astype(jnp.bfloat16)

    x_spec = pl.BlockSpec((row_tile, WCin), lambda i: (i, 0))
    w_spec = pl.BlockSpec((WCin, WoutCout), lambda i: (0, 0))

    # ---- pass 1: global per-channel batch statistics ----
    col_sum, col_ssq = pl.pallas_call(
        _conv_stats_kernel,
        out_shape=(jax.ShapeDtypeStruct((1, WoutCout), jnp.float32),
                   jax.ShapeDtypeStruct((1, WoutCout), jnp.float32)),
        grid=(n_tiles,),
        in_specs=[x_spec, w_spec],
        out_specs=[pl.BlockSpec((1, WoutCout), lambda i: (0, 0)),
                   pl.BlockSpec((1, WoutCout), lambda i: (0, 0))],
        compiler_params=pltpu.CompilerParams(
            dimension_semantics=("arbitrary",),
            vmem_limit_bytes=_VMEM_LIMIT),
    )(x2d, wbig)

    # Fold the per-(w,c) column stats into per-channel stats (tiny, plain JAX).
    cnt = float(N * H * Wout)                   # true (unpadded) element count
    mean_c = col_sum.reshape(Wout, Cout).sum(axis=0) / cnt
    ex2_c = col_ssq.reshape(Wout, Cout).sum(axis=0) / cnt
    var_c = jnp.maximum(ex2_c - mean_c * mean_c, 0.0)   # guard f32 cancellation
    inv_std = lax.rsqrt(var_c + EPS)
    scale_c = bn_gamma * inv_std                # [Cout]
    shift_c = bn_beta - mean_c * scale_c        # [Cout] (conv bias cancelled)
    scsh = jnp.stack([jnp.tile(scale_c, Wout),  # column order = w*Cout + co
                      jnp.tile(shift_c, Wout)], axis=0).astype(jnp.float32)

    # ---- pass 2: normalize + ReLU, lane-dense [rows, Wout*Cout] output ----
    out2d = pl.pallas_call(
        _conv_bn_relu_kernel,
        out_shape=jax.ShapeDtypeStruct((rows_pad, WoutCout), jnp.float32),
        grid=(n_tiles,),
        in_specs=[x_spec, w_spec,
                  pl.BlockSpec((2, WoutCout), lambda i: (0, 0))],
        out_specs=pl.BlockSpec((row_tile, WoutCout), lambda i: (i, 0)),
        compiler_params=pltpu.CompilerParams(
            dimension_semantics=("parallel",),   # lets v7x split across 2 TCs
            vmem_limit_bytes=_VMEM_LIMIT),
    )(x2d, wbig, scsh)

    # Back to NCHW only to match the PyTorch module's contract (keep the
    # lane-dense channels-last slab for real downstream consumers).
    out = out2d[:rows].reshape(N, H, Wout, Cout)
    return jnp.transpose(out, (0, 3, 1, 2))


# ----------------------------- reference ------------------------------------


def _reference(x, conv_w, conv_b, bn_gamma, bn_beta):
    """Plain-JAX reference of the PyTorch forward (training-mode BN), f32."""
    y = lax.conv_general_dilated(
        x, conv_w, window_strides=(1, 1), padding="VALID",
        dimension_numbers=("NCHW", "OIHW", "NCHW"),
        precision=lax.Precision.HIGHEST)
    y = y + conv_b[None, :, None, None]
    mean = jnp.mean(y, axis=(0, 2, 3), keepdims=True)
    var = jnp.mean((y - mean) ** 2, axis=(0, 2, 3), keepdims=True)
    yhat = (y - mean) * lax.rsqrt(var + EPS)
    return jnp.maximum(yhat * bn_gamma[None, :, None, None]
                       + bn_beta[None, :, None, None], 0.0)


if __name__ == "__main__":
    # Small shapes consistent with BasicBlock(in_channels=4, out_channels=8).
    N, Cin, H, W = 2, 4, 16, 32
    Cout, KW = 8, 17

    key = jax.random.PRNGKey(0)
    kx, kw_, kb, kg, kbeta = jax.random.split(key, 5)
    x = jax.random.normal(kx, (N, Cin, H, W), dtype=jnp.float32)
    conv_w = jax.random.normal(kw_, (Cout, Cin, 1, KW), dtype=jnp.float32) * 0.1
    conv_b = jax.random.normal(kb, (Cout,), dtype=jnp.float32) * 0.1
    bn_gamma = 1.0 + 0.1 * jax.random.normal(kg, (Cout,), dtype=jnp.float32)
    bn_beta = 0.1 * jax.random.normal(kbeta, (Cout,), dtype=jnp.float32)

    fwd = jax.jit(basic_block_forward, static_argnames=("row_tile",))
    # row_tile=8 -> 4 grid steps on rows=N*H=32 (exercises the tiled pipeline).
    out = jax.block_until_ready(fwd(x, conv_w, conv_b, bn_gamma, bn_beta,
                                    row_tile=8))

    assert out.shape == (N, Cout, H, W - KW + 1), out.shape

    # Tight check: reference fed the same bf16-rounded inputs the kernel uses
    # (isolates structural errors from the intentional bf16 cast).
    x_bf = x.astype(jnp.bfloat16).astype(jnp.float32)
    w_bf = conv_w.astype(jnp.bfloat16).astype(jnp.float32)
    ref_tight = _reference(x_bf, w_bf, conv_b, bn_gamma, bn_beta)
    err_t = float(jnp.max(jnp.abs(out - ref_tight)))
    assert jnp.allclose(out, ref_tight, rtol=2e-3, atol=2e-3), err_t

    # Loose check against the full-f32 reference (bf16 MXU inputs => ~1e-2 tol).
    ref_full = _reference(x, conv_w, conv_b, bn_gamma, bn_beta)
    err_f = float(jnp.max(jnp.abs(out - ref_full)))
    assert jnp.allclose(out, ref_full, rtol=2e-2, atol=2e-2), err_f

    print("KERNEL_OK")
</pallas_src>

<mosaic_0001>
module attributes {stable_mosaic.version = 11 : i64} {
  func.func @_conv_stats_kernel(%arg0: i32, %arg1: memref<8x128xbf16, #tpu.memory_space<vmem>>, %arg2: memref<128x128xbf16, #tpu.memory_space<vmem>>, %arg3: memref<1x128xf32, #tpu.memory_space<vmem>>, %arg4: memref<1x128xf32, #tpu.memory_space<vmem>>) attributes {dimension_semantics = [#tpu.dimension_semantics<arbitrary>], iteration_bounds = array<i64: 4>, scalar_prefetch = 0 : i64, scratch_operands = 0 : i64, tpu.core_type = #tpu.core_type<tc>, window_params = [{transform_indices = @transform_0, window_bounds = array<i64: 8, 128>}, {pipeline_mode = #tpu.pipeline_mode<synchronous>, transform_indices = @transform_1, window_bounds = array<i64: 128, 128>}, {pipeline_mode = #tpu.pipeline_mode<synchronous>, transform_indices = @transform_2, window_bounds = array<i64: 1, 128>}, {pipeline_mode = #tpu.pipeline_mode<synchronous>, transform_indices = @transform_3, window_bounds = array<i64: 1, 128>}]} {
    %c0_i32 = arith.constant 0 : i32
    %0 = arith.cmpi eq, %arg0, %c0_i32 : i32
    %1 = arith.extui %0 : i1 to i32
    %c0_i32_0 = arith.constant 0 : i32
    %2 = arith.cmpi ne, %1, %c0_i32_0 : i32
    scf.if %2 {
      %cst_14 = arith.constant 0.000000e+00 : f32
      %17 = vector.broadcast %cst_14 : f32 to vector<1x128xf32>
      %c0_15 = arith.constant 0 : index
      %c0_16 = arith.constant 0 : index
      %18 = vector.load %arg3[%c0_15, %c0_16] : memref<1x128xf32, #tpu.memory_space<vmem>>, vector<1x128xf32>
      tpu.vector_store %arg3[%c0_15, %c0_16], %17 {strides = array<i32>} : memref<1x128xf32, #tpu.memory_space<vmem>>, vector<1x128xf32>,
      %cst_17 = arith.constant 0.000000e+00 : f32
      %19 = vector.broadcast %cst_17 : f32 to vector<1x128xf32>
      %c0_18 = arith.constant 0 : index
      %c0_19 = arith.constant 0 : index
      %20 = vector.load %arg4[%c0_18, %c0_19] : memref<1x128xf32, #tpu.memory_space<vmem>>, vector<1x128xf32>
      tpu.vector_store %arg4[%c0_18, %c0_19], %19 {strides = array<i32>} : memref<1x128xf32, #tpu.memory_space<vmem>>, vector<1x128xf32>,
    } else {
    }
    %c0 = arith.constant 0 : index
    %c0_1 = arith.constant 0 : index
    %3 = vector.load %arg1[%c0, %c0_1] : memref<8x128xbf16, #tpu.memory_space<vmem>>, vector<8x128xbf16>
    %c0_2 = arith.constant 0 : index
    %c0_3 = arith.constant 0 : index
    %4 = vector.load %arg2[%c0_2, %c0_3] : memref<128x128xbf16, #tpu.memory_space<vmem>>, vector<128x128xbf16>
    %cst = arith.constant dense<0.000000e+00> : vector<8x128xf32>
    %5 = tpu.matmul %3, %4, %cst {dimension_numbers = #tpu.dot_dimension_numbers<[1], [0], [0], [1], [0, 0, 1, 1], [], []>} : vector<8x128xbf16>, vector<128x128xbf16>, vector<8x128xf32> -> vector<8x128xf32>
    %c0_4 = arith.constant 0 : index
    %c0_5 = arith.constant 0 : index
    %6 = vector.load %arg3[%c0_4, %c0_5] : memref<1x128xf32, #tpu.memory_space<vmem>>, vector<1x128xf32>
    %cst_6 = arith.constant dense<0.000000e+00> : vector<128xf32>
    %7 = vector.multi_reduction <add>, %5, %cst_6 [0] : vector<8x128xf32> to vector<128xf32>
    %8 = vector.shape_cast %7 : vector<128xf32> to vector<1x128xf32>
    %9 = arith.addf %6, %8 : vector<1x128xf32>
    %c0_7 = arith.constant 0 : index
    %c0_8 = arith.constant 0 : index
    %10 = vector.load %arg3[%c0_7, %c0_8] : memref<1x128xf32, #tpu.memory_space<vmem>>, vector<1x128xf32>
    tpu.vector_store %arg3[%c0_7, %c0_8], %9 {strides = array<i32>} : memref<1x128xf32, #tpu.memory_space<vmem>>, vector<1x128xf32>,
    %c0_9 = arith.constant 0 : index
    %c0_10 = arith.constant 0 : index
    %11 = vector.load %arg4[%c0_9, %c0_10] : memref<1x128xf32, #tpu.memory_space<vmem>>, vector<1x128xf32>
    %12 = arith.mulf %5, %5 : vector<8x128xf32>
    %cst_11 = arith.constant dense<0.000000e+00> : vector<128xf32>
    %13 = vector.multi_reduction <add>, %12, %cst_11 [0] : vector<8x128xf32> to vector<128xf32>
    %14 = vector.shape_cast %13 : vector<128xf32> to vector<1x128xf32>
    %15 = arith.addf %11, %14 : vector<1x128xf32>
    %c0_12 = arith.constant 0 : index
    %c0_13 = arith.constant 0 : index
    %16 = vector.load %arg4[%c0_12, %c0_13] : memref<1x128xf32, #tpu.memory_space<vmem>>, vector<1x128xf32>
    tpu.vector_store %arg4[%c0_12, %c0_13], %15 {strides = array<i32>} : memref<1x128xf32, #tpu.memory_space<vmem>>, vector<1x128xf32>,
    return
  }
  func.func @transform_0(%arg0: i32) -> (i32, i32) {
    %c0_i32 = arith.constant 0 : i32
    %c0_i32_0 = arith.constant 0 : i32
    return %arg0, %c0_i32 : i32, i32
  }
  func.func @transform_1(%arg0: i32) -> (i32, i32) {
    %c0_i32 = arith.constant 0 : i32
    %c0_i32_0 = arith.constant 0 : i32
    %c0_i32_1 = arith.constant 0 : i32
    return %c0_i32, %c0_i32_0 : i32, i32
  }
  func.func @transform_2(%arg0: i32) -> (i32, i32) {
    %c0_i32 = arith.constant 0 : i32
    %c0_i32_0 = arith.constant 0 : i32
    %c0_i32_1 = arith.constant 0 : i32
    return %c0_i32, %c0_i32_0 : i32, i32
  }
  func.func @transform_3(%arg0: i32) -> (i32, i32) {
    %c0_i32 = arith.constant 0 : i32
    %c0_i32_0 = arith.constant 0 : i32
    %c0_i32_1 = arith.constant 0 : i32
    return %c0_i32, %c0_i32_0 : i32, i32
  }
}

module attributes {stable_mosaic.version = 11 : i64} {
  func.func @_conv_bn_relu_kernel(%arg0: i32, %arg1: memref<8x128xbf16, #tpu.memory_space<vmem>>, %arg2: memref<128x128xbf16, #tpu.memory_space<vmem>>, %arg3: memref<2x128xf32, #tpu.memory_space<vmem>>, %arg4: memref<8x128xf32, #tpu.memory_space<vmem>>) attributes {dimension_semantics = [#tpu.dimension_semantics<parallel>], iteration_bounds = array<i64: 4>, scalar_prefetch = 0 : i64, scratch_operands = 0 : i64, tpu.core_type = #tpu.core_type<tc>, window_params = [{transform_indices = @transform_0, window_bounds = array<i64: 8, 128>}, {pipeline_mode = #tpu.pipeline_mode<synchronous>, transform_indices = @transform_1, window_bounds = array<i64: 128, 128>}, {pipeline_mode = #tpu.pipeline_mode<synchronous>, transform_indices = @transform_2, window_bounds = array<i64: 2, 128>}, {transform_indices = @transform_3, window_bounds = array<i64: 8, 128>}]} {
    %c0 = arith.constant 0 : index
    %c0_0 = arith.constant 0 : index
    %0 = vector.load %arg1[%c0, %c0_0] : memref<8x128xbf16, #tpu.memory_space<vmem>>, vector<8x128xbf16>
    %c0_1 = arith.constant 0 : index
    %c0_2 = arith.constant 0 : index
    %1 = vector.load %arg2[%c0_1, %c0_2] : memref<128x128xbf16, #tpu.memory_space<vmem>>, vector<128x128xbf16>
    %cst = arith.constant dense<0.000000e+00> : vector<8x128xf32>
    %2 = tpu.matmul %0, %1, %cst {dimension_numbers = #tpu.dot_dimension_numbers<[1], [0], [0], [1], [0, 0, 1, 1], [], []>} : vector<8x128xbf16>, vector<128x128xbf16>, vector<8x128xf32> -> vector<8x128xf32>
    %c0_3 = arith.constant 0 : index
    %c0_4 = arith.constant 0 : index
    %3 = vector.load %arg3[%c0_3, %c0_4] : memref<2x128xf32, #tpu.memory_space<vmem>>, vector<2x128xf32>
    %4 = vector.extract_strided_slice %3 {offsets = [0, 0], sizes = [1, 128], strides = [1, 1]} : vector<2x128xf32> to vector<1x128xf32>
    %5 = vector.broadcast %4 : vector<1x128xf32> to vector<8x128xf32>
    %6 = arith.mulf %2, %5 : vector<8x128xf32>
    %7 = vector.extract_strided_slice %3 {offsets = [1, 0], sizes = [1, 128], strides = [1, 1]} : vector<2x128xf32> to vector<1x128xf32>
    %8 = vector.broadcast %7 : vector<1x128xf32> to vector<8x128xf32>
    %9 = arith.addf %6, %8 : vector<8x128xf32>
    %cst_5 = arith.constant 0.000000e+00 : f32
    %10 = vector.broadcast %cst_5 : f32 to vector<8x128xf32>
    %11 = arith.maximumf %9, %10 : vector<8x128xf32>
    %c0_6 = arith.constant 0 : index
    %c0_7 = arith.constant 0 : index
    %12 = vector.load %arg4[%c0_6, %c0_7] : memref<8x128xf32, #tpu.memory_space<vmem>>, vector<8x128xf32>
    tpu.vector_store %arg4[%c0_6, %c0_7], %11 {strides = array<i32>} : memref<8x128xf32, #tpu.memory_space<vmem>>, vector<8x128xf32>,
    return
  }
  func.func @transform_0(%arg0: i32) -> (i32, i32) {
    %c0_i32 = arith.constant 0 : i32
    %c0_i32_0 = arith.constant 0 : i32
    return %arg0, %c0_i32 : i32, i32
  }
  func.func @transform_1(%arg0: i32) -> (i32, i32) {
    %c0_i32 = arith.constant 0 : i32
    %c0_i32_0 = arith.constant 0 : i32
    %c0_i32_1 = arith.constant 0 : i32
    return %c0_i32, %c0_i32_0 : i32, i32
  }
  func.func @transform_2(%arg0: i32) -> (i32, i32) {
    %c0_i32 = arith.constant 0 : i32
    %c0_i32_0 = arith.constant 0 : i32
    %c0_i32_1 = arith.constant 0 : i32
    return %c0_i32, %c0_i32_0 : i32, i32
  }
  func.func @transform_3(%arg0: i32) -> (i32, i32) {
    %c0_i32 = arith.constant 0 : i32
    %c0_i32_0 = arith.constant 0 : i32
    return %arg0, %c0_i32 : i32, i32
  }
}

</mosaic_0001>

<bundles_post_ra>
// kernel: tile.13
= control target key start
LH: loop header
LB: loop body
LE: loop exit
PB: predicated region body
PF: predicated region fallthrough
CT: control target
= control target key end

     0   :  { %s28_s0 = inlined_call_operand.vmem [shape: f32[8], index: 0, kind: input, shape index: {}]   ;;  %s29_s1 = inlined_call_operand.vmem [shape: f32[16,8], index: 1, kind: output, shape index: {}]  }
   0x1   :  { %v4_v0 = vld [vmem:[%s28_s0] ss:$0 sm:$0xff] }
   0x2   :  { %5 = vst [vmem:[%s29_s1] sm:$0xff] %v4_v0  ;;  %8 = vst [vmem:[%s29_s1 + $0x8] sm:$0xff] %v4_v0 }

// kernel: tile.18
= control target key start
LH: loop header
LB: loop body
LE: loop exit
PB: predicated region body
PF: predicated region fallthrough
CT: control target
= control target key end

     0   :  { %s131_s10 = smov 120   ;;  %s132_s11 = smov 104   ;;  %vm3_vm0 = vcmask 64512   ;;  %vm9_vm1 = vcmask 1048512   ;;  %vm15_vm2 = vcmask 982912   ;;  %vm21_vm3 = vcmask 917312   ;;  %s207_s0 = inlined_call_operand.vmem [shape: f32[16,8], index: 0, kind: input, shape index: {}]   ;;  %s208_s1 = inlined_call_operand.vmem [shape: f32[1,128], index: 1, kind: output, shape index: {}]  }
   0x1   :  { %v101_v0 = vld [vmem:[%s207_s0 + $0xf] sm:$0x1]   ;;  %v103_v1 = vld [vmem:[%s207_s0 + $0xd] sm:$0x1]   ;;  %v102_v2 = vld [vmem:[%s207_s0 + $0xe] sm:$0x1]  }
   0x2   :  { %7 = vrot.lane.b32.xlu0 %v101_v0, %s131_s10  ;;  %19 = vrot.lane.b32.xlu1 %v103_v1, %s132_s11  ;;  %v104_v3 = vld [vmem:[%s207_s0 + $0xc] sm:$0x1]   ;;  %s133_s16 = smov 112   ;;  %s134_s17 = smov 96   ;;  %v105_v4 = vld [vmem:[%s207_s0 + $0xb] sm:$0x1]  }
   0x3   :  { %v106_v5 = vld [vmem:[%s207_s0 + $0xa] sm:$0x1]   ;;  %v2_v6 = vld [vmem:[%s207_s0] sm:$0x1]   ;;  %s135_s24 = smov 88   ;;  %s136_s25 = smov 80  }
   0x4   :  { %4 = vst.msk [vmem:[#allocation0] sm:$0x1] %vm3_vm0, %v2_v6   ;;  %v107_v7 = vld [vmem:[%s207_s0 + $0x9] sm:$0x1]   ;;  %v108_v8 = vld [vmem:[%s207_s0 + $0x8] sm:$0x1]  }
   0x5   :  { %s137_s30 = smov 72   ;;  %s138_s2 = smov 64   ;;  %v109_v9 = vld [vmem:[%s207_s0 + $0x7] sm:$0x1]   ;;  %v110_v10 = vld [vmem:[%s207_s0 + $0x6] sm:$0x1]  }
   0x6   :  { %13 = vrot.lane.b32.xlu0 %v102_v2, %s133_s16  ;;  %25 = vrot.lane.b32.xlu1 %v104_v3, %s134_s17  ;;  %s139_s7 = smov 56   ;;  %s140_s8 = smov 48   ;;  %v111_v11 = vld [vmem:[%s207_s0 + $0x5] sm:$0x1]   ;;  %v112_v12 = vld [vmem:[%s207_s0 + $0x4] sm:$0x1]  }
   0x7   :  { %s141_s13 = smov 40   ;;  %s142_s14 = smov 32   ;;  %v113_v13 = vld [vmem:[%s207_s0 + $0x3] sm:$0x1]   ;;  %v114_v14 = vld [vmem:[%s207_s0 + $0x2] sm:$0x1]  }
   0x8   :  { %s143_s19 = smov 24   ;;  %s144_s20 = smov 16   ;;  %v115_v15 = vld [vmem:[%s207_s0 + $0x1] sm:$0x1]   ;;  %vm27_vm4 = vcmask 851712   ;;  %vm33_vm5 = vcmask 786112  }
   0x9   :  { %s145_s0 = smov 8   ;;  %vm39_vm6 = vcmask 720512   ;;  %vm45_vm7 = vcmask 654912   ;;  %vm51_vm8 = vcmask 589312   ;;  %vm57_vm9 = vcmask 523712  }
   0xa   :  { %31 = vrot.lane.b32.xlu0 %v105_v4, %s135_s24  ;;  %37 = vrot.lane.b32.xlu1 %v106_v5, %s136_s25  ;;  %vm63_vm10 = vcmask 458112   ;;  %vm69_vm11 = vcmask 392512   ;;  %vm75_vm12 = vcmask 326912   ;;  %vm81_vm13 = vcmask 261312  }
   0xb   :  { %vm87_vm14 = vcmask 195712   ;;  %vm93_vm15 = vcmask 130112  }
   0xe   :  { %43 = vrot.lane.b32.xlu0 %v107_v7, %s137_s30  ;;  %49 = vrot.lane.b32.xlu1 %v108_v8, %s138_s2 }
  0x12   :  { %55 = vrot.lane.b32.xlu0 %v109_v9, %s139_s7  ;;  %61 = vrot.lane.b32.xlu1 %v110_v10, %s140_s8 }
  0x16   :  { %67 = vrot.lane.b32.xlu0 %v111_v11, %s141_s13  ;;  %73 = vrot.lane.b32.xlu1 %v112_v12, %s142_s14 }
  0x1a   :  { %79 = vrot.lane.b32.xlu0 %v113_v13, %s143_s19  ;;  %85 = vrot.lane.b32.xlu1 %v114_v14, %s144_s20 }
  0x1e   :  { %91 = vrot.lane.b32.xlu0 %v115_v15, %s145_s0 }
  0x74   :  { %v8_v16 = vpop.permute.xlu0 %7   ;;  %v20_v17 = vpop.permute.xlu1 %19  }
  0x75   :  { %10 = vst.msk [vmem:[#allocation0] sm:$0x1] %vm9_vm1, %v8_v16  }
  0x78   :  { %v14_v18 = vpop.permute.xlu0 %13   ;;  %v26_v19 = vpop.permute.xlu1 %25  }
  0x79   :  { %16 = vst.msk [vmem:[#allocation0] sm:$0x1] %vm15_vm2, %v14_v18  }
  0x7a   :  { %22 = vst.msk [vmem:[#allocation0] sm:$0x1] %vm21_vm3, %v20_v17  }
  0x7b   :  { %28 = vst.msk [vmem:[#allocation0] sm:$0x1] %vm27_vm4, %v26_v19  }
  0x7c   :  { %v32_v20 = vpop.permute.xlu0 %31   ;;  %v38_v21 = vpop.permute.xlu1 %37  }
  0x7d   :  { %34 = vst.msk [vmem:[#allocation0] sm:$0x1] %vm33_vm5, %v32_v20  }
  0x7e   :  { %40 = vst.msk [vmem:[#allocation0] sm:$0x1] %vm39_vm6, %v38_v21  }
  0x80   :  { %v44_v22 = vpop.permute.xlu0 %43   ;;  %v50_v23 = vpop.permute.xlu1 %49  }
  0x81   :  { %46 = vst.msk [vmem:[#allocation0] sm:$0x1] %vm45_vm7, %v44_v22  }
  0x82   :  { %52 = vst.msk [vmem:[#allocation0] sm:$0x1] %vm51_vm8, %v50_v23  }
  0x84   :  { %v56_v24 = vpop.permute.xlu0 %55   ;;  %v62_v25 = vpop.permute.xlu1 %61  }
  0x85   :  { %58 = vst.msk [vmem:[#allocation0] sm:$0x1] %vm57_vm9, %v56_v24  }
  0x86   :  { %64 = vst.msk [vmem:[#allocation0] sm:$0x1] %vm63_vm10, %v62_v25  }
  0x88   :  { %v68_v26 = vpop.permute.xlu0 %67   ;;  %v74_v27 = vpop.permute.xlu1 %73  }
  0x89   :  { %70 = vst.msk [vmem:[#allocation0] sm:$0x1] %vm69_vm11, %v68_v26  }
  0x8a   :  { %76 = vst.msk [vmem:[#allocation0] sm:$0x1] %vm75_vm12, %v74_v27  }
  0x8c   :  { %v80_v28 = vpop.permute.xlu0 %79   ;;  %v86_v29 = vpop.permute.xlu1 %85  }
  0x8d   :  { %82 = vst.msk [vmem:[#allocation0] sm:$0x1] %vm81_vm13, %v80_v28  }
  0x8e   :  { %88 = vst.msk [vmem:[#allocation0] sm:$0x1] %vm87_vm14, %v86_v29  }
  0x90   :  { %v92_v30 = vpop.permute.xlu0 %91  }
  0x91   :  { %94 = vst.msk [vmem:[#allocation0] sm:$0x1] %vm93_vm15, %v92_v30  }
  0x98   :  { %v98_v31 = vld [vmem:[#allocation0] sm:$0x1] }
  0x99   :  { %100 = vst [vmem:[%s208_s1] sm:$0x1] %v98_v31 }

// kernel: basic_block_forward.2
= control target key start
LH: loop header
LB: loop body
LE: loop exit
PB: predicated region body
PF: predicated region fallthrough
CT: control target
= control target key end

     0   :  { %s411_s12 = smov 0   ;;  %s470_s0 = inlined_call_operand.vmem [shape: bf16[32,128], index: 0, kind: input, shape index: {}]   ;;  %s471_s1 = inlined_call_operand.vmem [shape: bf16[128,128], index: 1, kind: input, shape index: {}]   ;;  %s472_s2 = inlined_call_operand.vmem [shape: f32[1,128], index: 2, kind: output, shape index: {0}]   ;;  %s473_s3 = inlined_call_operand.vmem [shape: f32[1,128], index: 3, kind: output, shape index: {1}]  }
   0x1 LB: > { %s316_s13 = sadd.s32 4294967295, %s386_s12   ;;  %p319_p0 = scmp.ge.s32.totalorder %s386_s12, 1  ;;  %s386_s12 = sphi %s411_s12, %s14_s12  }
   0x2   : > { %p129_p1 = scmp.lt.s32.totalorder %s386_s12, 5 }
   0x4   : > { %p130_p2 = pnand %p319_p0, %p129_p1 }
   0x5   : > { %p147_p3 = scmp.lt.s32.totalorder (!%p130_p2), %s316_s13, 3  ;;  %p321_p4 = scmp.ne.s32.totalorder (!%p130_p2), %s316_s13, 0 }
   0x6   : > { %133 = sbr.rel (%p130_p2) target bundleno = 283 (0x11b), region = 28 }
   0xd   : > { %s148_s14 = scalar_select %p147_p3, %s316_s13, 3 }
   0xe   : > { %155 = sbr.rel (%p321_p4) target bundleno = 21 (0x15), region = 32  ;;  %v388_v0 = vmov (!%p321_p4), 0.0  }
   0xf   : > { %s320_s15 = sshll.u32 %s148_s14, 2  ;;  %156 = vst [vmem:[%s472_s2] sm:$0x1] (!%p321_p4), %v388_v0  ;;  %157 = vst [vmem:[%s473_s3] sm:$0x1] (!%p321_p4), %v388_v0 }
  0x10   : > { %s422_s18 = scalar_lea.vmem %s470_s0, %s320_s15 }
  0x15 PF: > { %v372_v1 = vld [vmem:[%s471_s1] sm:$0xff]   ;;  %v389_v2 = vmov 0.0   ;;  %v373_v3 = vld [vmem:[%s471_s1 + $0x8] sm:$0xff]   ;;  %vm390_vm0 = vmmov 0   ;;  %v374_v4 = vld [vmem:[%s471_s1 + $0x10] sm:$0xff]  }
  0x16   : > { %341 = vmatprep.subr.bf16.mxu0 %v389_v2  ;;  %357 = vmatprep.mubr.msk.bf16.mxu0 %vm390_vm0, %v389_v2  ;;  %v375_v5 = vld [vmem:[%s471_s1 + $0x18] sm:$0xff]   ;;  %v376_v6 = vld [vmem:[%s471_s1 + $0x20] sm:$0xff]   ;;  %v377_v7 = vld [vmem:[%s471_s1 + $0x28] sm:$0xff]  }
  0x17   : > { %342 = vmatpush3.bf16.msra.mxu0 %v372_v1  ;;  %v378_v8 = vld [vmem:[%s471_s1 + $0x30] sm:$0xff]   ;;  %v379_v9 = vld [vmem:[%s471_s1 + $0x38] sm:$0xff]   ;;  %v158_v10 = vld [vmem:[%s422_s18] sm:$0xf] }
  0x18   : > { %343 = vmatprep.subr.bf16.mxu0 %v389_v2  ;;  %v263_v25 = vld [vmem:[%s472_s2] sm:$0x1] }
  0x19   : > { %v272_v28 = vld [vmem:[%s473_s3] sm:$0x1] }
  0x1b   : > { %344 = vmatpush3.bf16.msra.mxu0 %v373_v3 }
  0x1c   : > { %345 = vmatprep.subr.bf16.mxu0 %v389_v2 }
  0x1f   : > { %346 = vmatpush3.bf16.msra.mxu0 %v374_v4 }
  0x20   : > { %347 = vmatprep.subr.bf16.mxu0 %v389_v2 }
  0x23   : > { %348 = vmatpush3.bf16.msra.mxu0 %v375_v5 }
  0x24   : > { %349 = vmatprep.subr.bf16.mxu0 %v389_v2 }
  0x27   : > { %350 = vmatpush3.bf16.msra.mxu0 %v376_v6 }
  0x28   : > { %351 = vmatprep.subr.bf16.mxu0 %v389_v2 }
  0x2b   : > { %352 = vmatpush3.bf16.msra.mxu0 %v377_v7 }
  0x2c   : > { %353 = vmatprep.subr.bf16.mxu0 %v389_v2 }
  0x2f   : > { %354 = vmatpush3.bf16.msra.mxu0 %v378_v8 }
  0x30   : > { %355 = vmatprep.subr.bf16.mxu0 %v389_v2 }
  0x33   : > { %356 = vmatpush3.bf16.msra.mxu0 %v379_v9 }
  0x36   : > { %358 = vmatmul.mubr.bf16.vlgmr.msra.gmra.mrb[0].mxu0 %v158_v10 }
 0x109   : > { %v257_v11 = vpop.f32.mrb[0].mxu0 }
 0x10a   : > { %v264_v12 = vrot.slane %v257_v11, 4  ;;  %v273_v13 = vmul.f32 %v257_v11, %v257_v11  ;;  %v359_v14 = vpop.f32.mrb[1].mxu0 }
 0x10b   : > { %v260_v15 = vpop.f32.mrb[2].mxu0 }
 0x10c   : > { %v265_v16 = vadd.f32 %v264_v12, %v257_v11  ;;  %v274_v17 = vrot.slane %v273_v13, 4  ;;  %v360_v18 = vpop.f32.mrb[3].mxu0 }
 0x10e   : > { %v266_v19 = vrot.slane %v265_v16, 2  ;;  %v275_v20 = vadd.f32 %v274_v17, %v273_v13 }
 0x110   : > { %v267_v21 = vadd.f32 %v266_v19, %v265_v16  ;;  %v276_v22 = vrot.slane %v275_v20, 2 }
 0x112   : > { %v268_v23 = vrot.slane %v267_v21, 1  ;;  %v277_v24 = vadd.f32 %v276_v22, %v275_v20 }
 0x114   : > { %v269_v26 = vadd.f32 %v268_v23, %v267_v21  ;;  %v278_v27 = vrot.slane %v277_v24, 1 }
 0x116   : > { %v270_v29 = vadd.f32 %v269_v26, %v263_v25  ;;  %v279_v30 = vadd.f32 %v278_v27, %v277_v24 }
 0x118   : > { %271 = vst [vmem:[%s472_s2] sm:$0x1] %v270_v29  ;;  %v280_v31 = vadd.f32 %v279_v30, %v272_v28 }
 0x11a   : > { %281 = vst [vmem:[%s473_s3] sm:$0x1] %v280_v31 }
 0x11b PF: > { %s14_s12 = sadd.s32 1, %s386_s12  }
 0x11c   : > { %p11_p5 = scmp.ge.s32.totalorder %s14_s12, 6  }
 0x11e   :  { %13 = sbr.rel (!%p11_p5) target bundleno = 1 (0x1), region = 66 }

// kernel: basic_block_forward.3
= control target key start
LH: loop header
LB: loop body
LE: loop exit
PB: predicated region body
PF: predicated region fallthrough
CT: control target
= control target key end

     0   :  { %s432_s12 = smov 0   ;;  %s476_s0 = inlined_call_operand.vmem [shape: bf16[32,128], index: 0, kind: input, shape index: {}]   ;;  %s477_s1 = inlined_call_operand.vmem [shape: bf16[128,128], index: 1, kind: input, shape index: {}]   ;;  %s478_s2 = inlined_call_operand.vmem [shape: f32[2,128], index: 2, kind: input, shape index: {}]   ;;  %s479_s3 = inlined_call_operand.vmem [shape: f32[32,128], index: 3, kind: output, shape index: {}]  }
   0x1 LB: > { %s338_s13 = sadd.s32 4294967295, %s408_s12   ;;  %p342_p0 = scmp.ge.s32.totalorder %s408_s12, 1  ;;  %s408_s12 = sphi %s432_s12, %s13_s12  }
   0x2   : > { %p136_p1 = scmp.lt.s32.totalorder %s408_s12, 5 }
   0x4   : > { %p137_p2 = pnand %p342_p0, %p136_p1 }
   0x5   : > { %v394_v0 = vld [vmem:[%s477_s1] sm:$0xff] (!%p137_p2)   ;;  %v410_v1 = vmov (!%p137_p2), 0.0   ;;  %v395_v2 = vld [vmem:[%s477_s1 + $0x8] sm:$0xff] (!%p137_p2)   ;;  %vm411_vm0 = vmmov (!%p137_p2), 0   ;;  %v396_v3 = vld [vmem:[%s477_s1 + $0x10] sm:$0xff] (!%p137_p2)   ;;  %p158_p3 = scmp.lt.s32.totalorder (!%p137_p2), %s338_s13, 3  ;;  %v273_v10 = vlaneseq (!%p137_p2) }
   0x6   : > { %140 = sbr.rel (%p137_p2) target bundleno = 257 (0x101), region = 32  ;;  %364 = vmatprep.subr.bf16.mxu0 (!%p137_p2), %v410_v1  ;;  %380 = vmatprep.mubr.msk.bf16.mxu0 (!%p137_p2), %vm411_vm0, %v410_v1  ;;  %v397_v4 = vld [vmem:[%s477_s1 + $0x18] sm:$0xff] (!%p137_p2)   ;;  %v398_v5 = vld [vmem:[%s477_s1 + $0x20] sm:$0xff] (!%p137_p2)   ;;  %v399_v6 = vld [vmem:[%s477_s1 + $0x28] sm:$0xff] (!%p137_p2)  }
   0x7   : > { %365 = vmatpush3.bf16.msra.mxu0 (!%p137_p2), %v394_v0  ;;  %v400_v7 = vld [vmem:[%s477_s1 + $0x30] sm:$0xff] (!%p137_p2)   ;;  %v401_v8 = vld [vmem:[%s477_s1 + $0x38] sm:$0xff] (!%p137_p2)   ;;  %v274_v11 = vshrl.u32 (!%p137_p2), %v273_v10, 7  ;;  %v272_v13 = vld [vmem:[%s478_s2] sm:$0x3] (!%p137_p2) }
   0x8   : > { %366 = vmatprep.subr.bf16.mxu0 (!%p137_p2), %v410_v1 }
   0x9   : > { %v275_v12 = vsub.s32 (!%p137_p2), 0, %v274_v11  ;;  %v280_v14 = vsub.s32 (!%p137_p2), 1, %v274_v11 }
   0xb   : > { %367 = vmatpush3.bf16.msra.mxu0 (!%p137_p2), %v395_v2  ;;  %v276_v15 = vrot.slane (!%p137_p2), %v272_v13, %v275_v12  ;;  %v281_v16 = vrot.slane (!%p137_p2), %v272_v13, %v280_v14 }
   0xc   : > { %368 = vmatprep.subr.bf16.mxu0 (!%p137_p2), %v410_v1 }
   0xd   : > { %s481_s13 = smov (!%p158_p3, %s338_s13), 3 }
   0xe   : > { %s343_s28 = sshll.u32 %s481_s13, 2  ;;  %s344_s9 = sshll.u32 %s481_s13, 3 }
   0xf   : > { %369 = vmatpush3.bf16.msra.mxu0 %v396_v3  ;;  %s161_s6 = scalar_lea.vmem %s476_s0, %s343_s28  ;;  %s165_s14 = scalar_lea.vmem %s479_s3, %s344_s9 }
  0x10   : > { %370 = vmatprep.subr.bf16.mxu0 %v410_v1  ;;  %v167_v9 = vld [vmem:[%s161_s6] sm:$0xf] }
  0x13   : > { %371 = vmatpush3.bf16.msra.mxu0 %v397_v4 }
  0x14   : > { %372 = vmatprep.subr.bf16.mxu0 %v410_v1 }
  0x17   : > { %373 = vmatpush3.bf16.msra.mxu0 %v398_v5 }
  0x18   : > { %374 = vmatprep.subr.bf16.mxu0 %v410_v1 }
  0x1b   : > { %375 = vmatpush3.bf16.msra.mxu0 %v399_v6 }
  0x1c   : > { %376 = vmatprep.subr.bf16.mxu0 %v410_v1 }
  0x1f   : > { %377 = vmatpush3.bf16.msra.mxu0 %v400_v7 }
  0x20   : > { %378 = vmatprep.subr.bf16.mxu0 %v410_v1 }
  0x23   : > { %379 = vmatpush3.bf16.msra.mxu0 %v401_v8 }
  0x26   : > { %381 = vmatmul.mubr.bf16.vlgmr.msra.gmra.mrb[0].mxu0 %v167_v9 }
  0xf9   : > { %v266_v17 = vpop.f32.mrb[0].mxu0 }
  0xfa   : > { %v277_v18 = vmul.f32 %v276_v15, %v266_v17  ;;  %v382_v19 = vpop.f32.mrb[1].mxu0 }
  0xfb   : > { %v269_v20 = vpop.f32.mrb[2].mxu0 }
  0xfc   : > { %v282_v21 = vadd.f32 %v281_v16, %v277_v18  ;;  %v383_v22 = vpop.f32.mrb[3].mxu0 }
  0xfe   : > { %v283_v23 = vmax.f32 %v282_v21, 0.0 }
 0x100   : > { %284 = vst [vmem:[%s165_s14] sm:$0xff] %v283_v23 }
 0x101 PF: > { %s13_s12 = sadd.s32 1, %s408_s12  }
 0x102   : > { %p10_p4 = scmp.ge.s32.totalorder %s13_s12, 6  }
 0x104   :  { %12 = sbr.rel (!%p10_p4) target bundleno = 1 (0x1), region = 62 }

</bundles_post_ra>
